<compile_context>
chip_gen: v6e
topology: v6e:2x2x1
jax: 0.10.0
libtpu: 0.0.40
codegen_flags: <defaults>
</compile_context>

<pallas_src>
import jax
import jax.numpy as jnp
from jax.experimental import pallas as pl
from jax.experimental.pallas import tpu as pltpu


# ---------------------------------------------------------------------------
# Shared per-evaluation body: f(z, t) on a (1, 2) VMEM tile with SMEM scalars.
# ---------------------------------------------------------------------------
def _f_block(z, w00, w01, w10, w11, t_scalar):
    z0 = z[:, 0:1]                                            # (1, 1) lane slice
    z1 = z[:, 1:2]                                            # (1, 1) lane slice
    # sin on a (1,1) vreg (EUP); scalar is broadcast into the vreg first.
    sin_t = jnp.sin(jnp.full((1, 1), t_scalar * 0.5, dtype=jnp.float32))
    f0 = w00 * z1                                             # scalar * vector
    f1 = w01 * z0 + w10 * z1 + w11 * sin_t                    # scalar * vector
    lane = jax.lax.broadcasted_iota(jnp.int32, (1, 2), 1)
    # Build the full (1, 2) tile directly -> one lane-dense store by the caller.
    return jnp.where(lane == 0, f0, f1)


# ---------------------------------------------------------------------------
# Single-shot forward kernel (exact module semantics).
# ---------------------------------------------------------------------------
def linear_odef_kernel(s_ref, x_ref, o_ref):
    # s_ref: SMEM (8,) f32 = [w00, w01, w10, w11, t, 0, 0, 0]
    # x_ref: VMEM (1, 2) f32 ; o_ref: VMEM (1, 2) f32
    w00 = s_ref[0]
    w01 = s_ref[1]
    w10 = s_ref[2]
    w11 = s_ref[3]
    t = s_ref[4]
    o_ref[...] = _f_block(x_ref[...], w00, w01, w10, w11, t)   # single dense store


def linear_odef_forward(x, t, W):
    """x: (1, 2), t: scalar-like, W: (2, 2) -> z: (1, 2) float32."""
    x = jnp.asarray(x, jnp.float32).reshape(1, 2)
    t = jnp.asarray(t, jnp.float32).reshape(())
    W = jnp.asarray(W, jnp.float32).reshape(2, 2)
    # Pack all scalars into one tiny array -> one SMEM transfer instead of two.
    scalars = jnp.concatenate(
        [W.reshape(4), t.reshape(1), jnp.zeros((3,), jnp.float32)])
    return pl.pallas_call(
        linear_odef_kernel,
        out_shape=jax.ShapeDtypeStruct((1, 2), jnp.float32),
        in_specs=[
            pl.BlockSpec(memory_space=pltpu.MemorySpace.SMEM),   # packed W, t
            pl.BlockSpec(memory_space=pltpu.MemorySpace.VMEM),   # x
        ],
        out_specs=pl.BlockSpec(memory_space=pltpu.MemorySpace.VMEM),
    )(scalars, x)


# ---------------------------------------------------------------------------
# Fused forward-Euler time loop: one pallas_call for n_steps evaluations of f.
# State z lives in a VMEM scratch accumulator across the ("arbitrary") grid axis.
# ---------------------------------------------------------------------------
def euler_fused_kernel(s_ref, z0_ref, zT_ref, z_sc):
    # s_ref: SMEM (8,) f32 = [w00, w01, w10, w11, t0, dt, 0, 0]
    step = pl.program_id(0)

    @pl.when(step == 0)
    def _():
        z_sc[...] = z0_ref[...]

    w00 = s_ref[0]
    w01 = s_ref[1]
    w10 = s_ref[2]
    w11 = s_ref[3]
    t0 = s_ref[4]
    dt = s_ref[5]
    t = t0 + dt * step.astype(jnp.float32)

    z = z_sc[...]
    z_sc[...] = z + dt * _f_block(z, w00, w01, w10, w11, t)

    @pl.when(step == pl.num_programs(0) - 1)
    def _():
        zT_ref[...] = z_sc[...]


def linear_odef_euler_integrate(z_init, t0, dt, n_steps, W):
    """Integrate dz/dt = f(z, t) with forward Euler, fully inside one kernel."""
    z_init = jnp.asarray(z_init, jnp.float32).reshape(1, 2)
    W = jnp.asarray(W, jnp.float32).reshape(2, 2)
    scalars = jnp.concatenate([
        W.reshape(4),
        jnp.asarray([t0, dt], jnp.float32),
        jnp.zeros((2,), jnp.float32),
    ])
    return pl.pallas_call(
        euler_fused_kernel,
        out_shape=jax.ShapeDtypeStruct((1, 2), jnp.float32),
        grid_spec=pltpu.PrefetchScalarGridSpec(
            num_scalar_prefetch=0,
            grid=(n_steps,),
            in_specs=[
                pl.BlockSpec(memory_space=pltpu.MemorySpace.SMEM),  # W, t0, dt
                pl.BlockSpec((1, 2), lambda i: (0, 0)),             # z_init
            ],
            out_specs=pl.BlockSpec((1, 2), lambda i: (0, 0)),       # z_T (resident)
            scratch_shapes=[pltpu.VMEM((1, 2), jnp.float32)],       # state accumulator
        ),
        compiler_params=pltpu.CompilerParams(
            dimension_semantics=("arbitrary",)),
    )(scalars, z_init)


# ---------------------------------------------------------------------------
# Pure-JAX references.
# ---------------------------------------------------------------------------
def _reference_f(x, t, W):
    z0 = W[0, 0] * x[:, 1]
    z1 = W[0, 1] * x[:, 0] + W[1, 0] * x[:, 1] + W[1, 1] * jnp.sin(t * 0.5)
    return jnp.stack([z0, z1], axis=1)


def _reference_euler(z_init, t0, dt, n_steps, W):
    def step(z, i):
        t = t0 + dt * i
        return z + dt * _reference_f(z, t, W), None

    steps = jnp.arange(n_steps, dtype=jnp.float32)
    zT, _ = jax.lax.scan(step, z_init, steps)
    return zT


if __name__ == "__main__":
    key = jax.random.PRNGKey(0)
    kx, kt = jax.random.split(key)

    # Deterministic 2x2 bias-free Linear weight (the module's __init__ arg).
    W = jnp.array([[-0.1, 2.0],
                   [-2.0, -0.1]], dtype=jnp.float32)

    # batch=1 state of dim 2 and a scalar time, as the forward implies.
    x = jax.random.normal(kx, (1, 2), dtype=jnp.float32)
    t = jax.random.uniform(kt, (), dtype=jnp.float32)

    # 1) Single forward evaluation (module semantics).
    z = jax.block_until_ready(linear_odef_forward(x, t, W))
    z_ref = _reference_f(x, t, W)
    assert z.shape == (1, 2) and z.dtype == jnp.float32
    assert jnp.allclose(z, z_ref, atol=1e-5, rtol=1e-5)

    # 2) Fused solver time loop (launch/DMA cost amortized over n_steps).
    t0, dt, n_steps = 0.0, 0.01, 256
    zT = jax.block_until_ready(linear_odef_euler_integrate(x, t0, dt, n_steps, W))
    zT_ref = _reference_euler(x, t0, dt, n_steps, W)
    assert zT.shape == (1, 2) and zT.dtype == jnp.float32
    assert jnp.allclose(zT, zT_ref, atol=1e-4, rtol=1e-4)

    print("KERNEL_OK")
</pallas_src>

<mosaic_0001>
module attributes {stable_mosaic.version = 11 : i64} {
  func.func @linear_odef_kernel(%arg0: memref<8xf32, #tpu.memory_space<smem>>, %arg1: memref<1x2xf32, #tpu.memory_space<vmem>>, %arg2: memref<1x2xf32, #tpu.memory_space<vmem>>) attributes {dimension_semantics = [], scalar_prefetch = 0 : i64, scratch_operands = 0 : i64, tpu.core_type = #tpu.core_type<tc>} {
    %c0 = arith.constant 0 : index
    %0 = memref.load %arg0[%c0] : memref<8xf32, #tpu.memory_space<smem>>
    %c1 = arith.constant 1 : index
    %1 = memref.load %arg0[%c1] : memref<8xf32, #tpu.memory_space<smem>>
    %c2 = arith.constant 2 : index
    %2 = memref.load %arg0[%c2] : memref<8xf32, #tpu.memory_space<smem>>
    %c3 = arith.constant 3 : index
    %3 = memref.load %arg0[%c3] : memref<8xf32, #tpu.memory_space<smem>>
    %c4 = arith.constant 4 : index
    %4 = memref.load %arg0[%c4] : memref<8xf32, #tpu.memory_space<smem>>
    %c0_0 = arith.constant 0 : index
    %c0_1 = arith.constant 0 : index
    %5 = vector.load %arg1[%c0_0, %c0_1] : memref<1x2xf32, #tpu.memory_space<vmem>>, vector<1x2xf32>
    %6 = vector.extract_strided_slice %5 {offsets = [0, 0], sizes = [1, 1], strides = [1, 1]} : vector<1x2xf32> to vector<1x1xf32>
    %7 = vector.extract_strided_slice %5 {offsets = [0, 1], sizes = [1, 1], strides = [1, 1]} : vector<1x2xf32> to vector<1x1xf32>
    %cst = arith.constant 5.000000e-01 : f32
    %8 = arith.mulf %4, %cst : f32
    %9 = vector.broadcast %8 : f32 to vector<1x1xf32>
    %10 = math.sin %9 : vector<1x1xf32>
    %11 = vector.broadcast %0 : f32 to vector<1x1xf32>
    %12 = arith.mulf %11, %7 : vector<1x1xf32>
    %13 = vector.broadcast %1 : f32 to vector<1x1xf32>
    %14 = arith.mulf %13, %6 : vector<1x1xf32>
    %15 = vector.broadcast %2 : f32 to vector<1x1xf32>
    %16 = arith.mulf %15, %7 : vector<1x1xf32>
    %17 = arith.addf %14, %16 : vector<1x1xf32>
    %18 = vector.broadcast %3 : f32 to vector<1x1xf32>
    %19 = arith.mulf %18, %10 : vector<1x1xf32>
    %20 = arith.addf %17, %19 : vector<1x1xf32>
    %21 = tpu.iota {dimensions = array<i32: 1>} : vector<1x2xi32>
    %c0_i32 = arith.constant 0 : i32
    %22 = vector.broadcast %c0_i32 : i32 to vector<1x2xi32>
    %23 = arith.cmpi eq, %21, %22 : vector<1x2xi32>
    %24 = vector.shape_cast %12 : vector<1x1xf32> to vector<1x1xf32>
    %25 = vector.broadcast %24 : vector<1x1xf32> to vector<1x2xf32>
    %26 = vector.shape_cast %20 : vector<1x1xf32> to vector<1x1xf32>
    %27 = vector.broadcast %26 : vector<1x1xf32> to vector<1x2xf32>
    %28 = arith.select %23, %25, %27 : vector<1x2xi1>, vector<1x2xf32>
    %c0_2 = arith.constant 0 : index
    %c0_3 = arith.constant 0 : index
    %29 = vector.load %arg2[%c0_2, %c0_3] : memref<1x2xf32, #tpu.memory_space<vmem>>, vector<1x2xf32>
    tpu.vector_store %arg2[%c0_2, %c0_3], %28 {strides = array<i32>} : memref<1x2xf32, #tpu.memory_space<vmem>>, vector<1x2xf32>,
    return
  }
}

</mosaic_0001>

<bundles_post_ra>
// kernel: tpu_custom_call.1
= control target key start
LH: loop header
LB: loop body
LE: loop exit
PB: predicated region body
PF: predicated region fallthrough
CT: control target
= control target key end

     0   :  { %7 = vsyncpa [#allocation4], 0  ;;  %s311_s0 = inlined_call_operand.hbm [shape: f32[8], index: 0, kind: input, shape index: {}]   ;;  %s312_s1 = inlined_call_operand.vmem [shape: f32[1,2], index: 1, kind: input, shape index: {}]   ;;  %s313_s2 = inlined_call_operand.hbm [shape: f32[1,2], index: 2, kind: output, shape index: {}]  }
   0x1   :  { %8 = vsyncpa [#allocation3], 0  ;;  %s250_s9 = smov [#allocation2]  }
   0x2   :  { %16 = dma.hbm_to_smem %s311_s0, 16, %s250_s9, [#allocation4]  }
   0x3   :  { %246 = dma.done.wait [#allocation4], 16  }
   0x4   :  { %247 = vsyncadd [#allocation4], 4294967280 }
   0x5   :  { %22 = sfence }
   0x6   :  { %s189_s12 = sld [smem:[#allocation2 + $0x2]]  ;;  %v251_v0 = vmov 0   ;;  %v252_v1 = vmov 1   ;;  %v282_v2 = vld [vmem:[%s312_s1] sm:$0x1]  ;;  %s253_s17 = smov 127  }
   0x7   :  { %212 = vset.pattern.permute.xlu1 %v251_v0  ;;  %211 = vset.pattern.permute.xlu0 %v252_v1  ;;  %s191_s13 = sld [smem:[#allocation2 + $0x4]]  ;;  %v254_v19 = vmov 683565275   ;;  %v255_v21 = vmov 2475754826   ;;  %s260_s19 = smov [#allocation5]  }
   0x8   :  { %s23_s16 = sld [smem:[#allocation2]]  ;;  %v256_v23 = vmov 2131351028   ;;  %v257_v25 = vmov 2102212464   ;;  %s179_s20 = sshll.u32 %s260_s19, 4  ;;  %s180_s20 = int_to_ptr.vmem [resolvable:$true] %s179_s20 }
   0x9   :  { %v258_v27 = vmov 920167782   ;;  %v259_v34 = vmov 1326507024   ;;  %s188_s1 = sld [smem:[#allocation2 + $0x1]]  ;;  %vm171_vm14 = vcmask 8192   ;;  %p231_p1 = scmp.lt.s32.totalorder %s180_s20, %s180_s20 }
   0xa   :  { %s190_s18 = sld [smem:[#allocation2 + $0x3]]  ;;  %s226_s21 = scalar_lea.vmem %s180_s20, 16 }
   0xb   :  { %p227_p0 = scmp.ne.s32.totalorder %s180_s20, %s226_s21  ;;  %s230_s22 = scalar_lea.vmem %s180_s20, 32 }
   0xc   :  { %v139_v3 = vstv %s189_s12  ;;  %p232_p2 = scmp.lt.s32.totalorder %s230_s22, %s226_s21 }
   0xd   :  { %v140_v4 = vmul.f32 %v139_v3, %v282_v2  ;;  %s29_s0 = smul.f32 0.5, %s191_s13 }
   0xe   :  { %v135_v5 = vstv %s23_s16  ;;  %p233_p3 = por %p232_p2, %p231_p1 }
   0xf   :  { %142 = vrot.lane.b32.xlu0 %v140_v4, %s253_s17  ;;  %v285_v6 = vstv %s29_s0  ;;  %v136_v7 = vmul.f32 %v135_v5, %v282_v2 }
  0x10   :  { %v34_v8 = vand.u32 2139095040, %v285_v6  ;;  %v31_v10 = vand.u32 2147483647, %v285_v6  ;;  %vm33_vm7 = vcmp.lt.s32.totalorder %v285_v6, 0  ;;  %vm123_vm12 = vweird.f32 %v285_v6  ;;  %p234_p4 = pnand %p233_p3, %p227_p0 }
  0x12   :  { %v35_v9 = vshrl.u32 %v34_v8, 23  ;;  %v38_v13 = vand.u32 8388607, %v31_v10  ;;  %vm32_vm8 = vcmp.le.f32.partialorder %v31_v10, 0.7853982 }
  0x13   :  { %154 = vperm.xlu0 %211, %v136_v7  }
  0x14   :  { %v192_v11 = vadd.s32 4294967169, %v35_v9  ;;  %v39_v16 = vor.u32 8388608, %v38_v13 }
  0x16   :  { %v41_v12 = vadd.s32 1, %v192_v11  ;;  %v79_v36 = vshll.u32 %v39_v16, 8 }
  0x17   :  { %213 = vset.pattern.permute.xlu0 %v251_v0 }
  0x18   :  { %vm42_vm0 = vcmp.gt.s32.totalorder %v41_v12, 0 }
  0x19   :  { %v43_v14 = vsel %vm42_vm0, %v41_v12, 0 }
  0x1a   :  { %v45_v15 = vand.u32 31, %v43_v14  ;;  %v44_v17 = vshrl.u32 %v43_v14, 5 }
  0x1c   :  { %v46_v18 = vsub.s32 32, %v45_v15  ;;  %v48_v20 = vshll.u32 %v254_v19, %v45_v15  ;;  %v51_v22 = vshll.u32 %v255_v21, %v45_v15  ;;  %v54_v24 = vshll.u32 %v256_v23, %v45_v15 }
  0x1d   :  { %v57_v26 = vshll.u32 %v257_v25, %v45_v15  ;;  %v60_v28 = vshll.u32 %v258_v27, %v45_v15  ;;  %vm63_vm1 = vcmp.lt.s32.totalorder %v44_v17, 1  ;;  %vm66_vm2 = vcmp.lt.s32.totalorder %v44_v17, 4 }
  0x1e   :  { %v47_v29 = vshrl.u32 %v254_v19, %v46_v18  ;;  %v49_v30 = vshrl.u32 %v255_v21, %v46_v18  ;;  %v52_v31 = vshrl.u32 %v256_v23, %v46_v18  ;;  %v55_v32 = vshrl.u32 %v257_v25, %v46_v18 }
  0x1f   :  { %v58_v33 = vshrl.u32 %v258_v27, %v46_v18  ;;  %v61_v35 = vshrl.u32 %v259_v34, %v46_v18  ;;  %vm64_vm3 = vcmp.lt.s32.totalorder %v44_v17, 2  ;;  %vm65_vm4 = vcmp.lt.s32.totalorder %v44_v17, 3 }
  0x20   :  { %v50_v37 = vor.u32 %v49_v30, %v48_v20  ;;  %v53_v38 = vor.u32 %v52_v31, %v51_v22  ;;  %v56_v39 = vor.u32 %v55_v32, %v54_v24 }
  0x21   :  { %v59_v40 = vor.u32 %v58_v33, %v57_v26  ;;  %v62_v41 = vor.u32 %v61_v35, %v60_v28 }
  0x22   :  { %v67_v42 = vsel %vm63_vm1, %v47_v29, %v50_v37  ;;  %v68_v43 = vsel %vm66_vm2, %v56_v39, 2102212464  ;;  %v71_v44 = vsel %vm63_vm1, %v50_v37, %v53_v38  ;;  %v75_v45 = vsel %vm63_vm1, %v53_v38, %v56_v39 }
  0x23   :  { %v69_v46 = vsel %vm65_vm4, %v53_v38, %v68_v43  ;;  %v72_v47 = vsel %vm66_vm2, %v59_v40, 920167782  ;;  %v76_v48 = vsel %vm66_vm2, %v62_v41, 1326507024  ;;  %v146_v38 = vstv %s190_s18 }
  0x24   :  { %v73_v49 = vsel %vm65_vm4, %v56_v39, %v72_v47  ;;  %v77_v50 = vsel %vm65_vm4, %v59_v40, %v76_v48  ;;  %v70_v51 = vsel %vm64_vm3, %v67_v42, %v69_v46 }
  0x25   :  { %v74_v52 = vsel %vm64_vm3, %v71_v44, %v73_v49  ;;  %v78_v53 = vsel %vm64_vm3, %v75_v45, %v77_v50  ;;  %v86_v58 = vmul.u32 %v79_v36, %v70_v51  ;;  %v149_v44 = vlaneseq }
  0x26   :  { %v292_v54 = vmul.u32.u64.low %v79_v36, %v78_v53  ;;  %v293_v55 = vmul.u32.u64.high %v79_v36, %v78_v53, %v292_v54  ;;  %v295_v56 = vmul.u32.u64.low %v79_v36, %v74_v52  ;;  %v296_v57 = vmul.u32.u64.high %v79_v36, %v74_v52, %v295_v56 }
  0x27   :  { %v137_v36 = vstv %s188_s1  ;;  %v158_v45 = vshrl.u32 %v149_v44, 7  ;;  %v150_v48 = vand.u32 127, %v149_v44 }
  0x28   :  { %vm88_vm5 = vc.u32 %v293_v55, %v295_v56  ;;  %v89_v59 = vadd.s32 1, %v296_v57  ;;  %v87_v11 = vadd.s32 %v295_v56, %v293_v55  ;;  %v138_v39 = vmul.f32 %v137_v36, %v282_v2 }
  0x29   :  { %v159_v46 = vsub.s32 0, %v158_v45  ;;  %vm151_vm13 = vcmp.eq.s32.totalorder %v150_v48, 0 }
  0x2a   :  { %v90_v60 = vsel %vm88_vm5, %v89_v59, %v296_v57 }
  0x2b   :  { %v91_v61 = vadd.s32 %v90_v60, %v86_v58 }
  0x2d   :  { %v92_v62 = vadd.s32 536870912, %v91_v61 }
  0x2f   :  { %v93_v63 = vshrl.u32 %v92_v62, 30 }
  0x31   :  { %v94_v0 = vshll.u32 %v93_v63, 30  ;;  %v117_v25 = vsub.s32 4, %v93_v63 }
  0x33   :  { %v95_v1 = vsub.s32 %v91_v61, %v94_v0  ;;  %v118_v26 = vsel %vm33_vm7, %v117_v25, %v93_v63 }
  0x34   :  { %v120_v27 = vsel %vm32_vm8, 0, %v118_v26 }
  0x35   :  { %v97_v3 = vsub.s32 0, %v95_v1  ;;  %v124_v28 = vadd.s32 3, %v120_v27 }
  0x37   :  { %v193_v4 = vmin.u32 %v97_v3, %v95_v1  ;;  %v125_v31 = vand.u32 3, %v124_v28 }
  0x39   :  { %v99_v5 = vclz %v193_v4  ;;  %vm127_vm9 = vcmp.eq.s32.totalorder %v125_v31, 0  ;;  %vm130_vm10 = vcmp.eq.s32.totalorder %v125_v31, 2  ;;  %vm126_vm11 = vcmp.lt.s32.totalorder %v125_v31, 2 }
  0x3b   :  { %v194_v7 = vadd.s32 4294967294, %v99_v5 }
  0x3d   :  { %vm195_vm6 = vcmp.lt.s32.totalorder %v194_v7, 0 }
  0x3e   :  { %v102_v8 = vsel %vm195_vm6, 0, %v194_v7 }
  0x3f   :  { %v107_v9 = vsub.s32 4294967266, %v102_v8  ;;  %v103_v12 = vsub.s32 32, %v102_v8  ;;  %v104_v14 = vshll.u32 %v95_v1, %v102_v8 }
  0x41   :  { %v108_v13 = vadd.s32 127, %v107_v9  ;;  %v105_v15 = vshrl.u32 %v87_v11, %v103_v12 }
  0x43   :  { %v109_v16 = vshll.u32 %v108_v13, 23  ;;  %v106_v17 = vor.u32 %v105_v15, %v104_v14 }
  0x45   :  { %v110_v18 = vor.u32 4788187, %v109_v16  ;;  %v113_v20 = vcvt.s32.f32 %v106_v17 }
  0x47   :  { %v111_v19 = vand.u32 2147483647, %v110_v18 }
  0x49   :  { %v114_v21 = vmul.f32 %v113_v20, %v111_v19 }
  0x4b   :  { %v115_v22 = vxor.u32 2147483648, %v114_v21 }
  0x4d   :  { %v116_v23 = vsel %vm33_vm7, %v115_v22, %v114_v21 }
  0x4e   :  { %v119_v24 = vsel %vm32_vm8, %v285_v6, %v116_v23 }
  0x4f   :  { %214 = vcosq.f32 %v119_v24 }
  0x50   :  { %216 = vsinq.f32 %v119_v24 }
  0x5c   :  { %v215_v29 = vpop.eup %214 }
  0x5d   :  { %v217_v30 = vpop.eup %216  ;;  %v131_v33 = vxor.u32 2147483648, %v215_v29 }
  0x5e   :  { %v128_v32 = vxor.u32 2147483648, %v217_v30 }
  0x5f   :  { %v132_v34 = vsel %vm130_vm10, %v131_v33, %v217_v30 }
  0x60   :  { %v129_v10 = vsel %vm127_vm9, %v215_v29, %v128_v32 }
  0x61   :  { %v133_v35 = vsel %vm126_vm11, %v129_v10, %v132_v34 }
  0x62   :  { %v134_v37 = vsel %vm123_vm12, nan, %v133_v35 }
  0x63   :  { %v147_v40 = vmul.f32 %v146_v38, %v134_v37 }
  0x81   :  { %v143_v41 = vpop.permute.xlu0 %142 }
  0x82   :  { %v145_v42 = vadd.f32 %v143_v41, %v138_v39 }
  0x84   :  { %v148_v43 = vadd.f32 %v147_v40, %v145_v42 }
  0x86   :  { %163 = vperm.xlu1 %212, %v148_v43  }
  0x8e   :  { %v155_v47 = vpop.permute.xlu0 %154 }
  0x8f   :  { %v160_v49 = vrot.slane %v155_v47, %v159_v46 }
 0x101   :  { %v164_v6 = vpop.permute.xlu1 %163 }
 0x102   :  { %v169_v50 = vrot.slane %v164_v6, %v159_v46 }
 0x104   :  { %v170_v51 = vsel %vm151_vm13, %v160_v49, %v169_v50 }
 0x105   :  { %172 = vst.msk [vmem:[#allocation5] sm:$0x1] %vm171_vm14, %v170_v51 }
 0x106   :  { %237 = shalt.err (!%p234_p4)
}
 0x107   :  { %182 = dma.vmem_to_hbm [thread:$0]  %s180_s20, 16, %s313_s2, [#allocation3]  }
 0x108   :  { %248 = dma.done.wait [#allocation3], 16  }
 0x109   :  { %249 = vsyncadd [#allocation3], 4294967280 }
 0x10a   :  { %186 = vsyncpa [#allocation3], 1 }
 0x10b   :  { %187 = vsyncpa [#allocation4], 1 }

</bundles_post_ra>
